<compile_context>
chip_gen: v5e
topology: v5e:2x2
jax: 0.10.0
libtpu: 0.0.40
codegen_flags: <defaults>
</compile_context>

<pallas_src>
import jax
import jax.numpy as jnp
from jax.experimental import pallas as pl
from jax.experimental.pallas import tpu as pltpu


def _round_up(n, m):
    return ((n + m - 1) // m) * m


def encoder_kernel(x_ref, w1_ref, b1_ref, w2_ref, b2_ref, wh_ref, bh_ref, out_ref):
    # x tile arrives f32 from HBM; cast to bf16 here (VPU has huge slack) so the
    # wrapper never runs a separate cast pass over x.
    x = x_ref[...].astype(jnp.bfloat16)

    # fc1 + relu  (x_dim -> 512); MXU accumulates in f32, bias/ReLU epilogue in f32.
    h1 = jnp.dot(x, w1_ref[...], preferred_element_type=jnp.float32) + b1_ref[...]
    h1 = jnp.maximum(h1, 0.0).astype(jnp.bfloat16)

    # fc2 + relu  (512 -> 256)
    h2 = jnp.dot(h1, w2_ref[...], preferred_element_type=jnp.float32) + b2_ref[...]
    h2 = jnp.maximum(h2, 0.0).astype(jnp.bfloat16)

    # fused mean|log_var head (256 -> 2*z_dim). Narrow output block: masked store
    # in-kernel is negligible, and it cuts the HBM writeback stream 8x.
    out_ref[...] = (
        jnp.dot(h2, wh_ref[...], preferred_element_type=jnp.float32) + bh_ref[...]
    )


def prepare_params(params):
    """One-time parameter preprocessing (hoisted out of the per-call path):
    bf16 MXU weights, f32 biases, mean|log_var heads concatenated."""
    wh = jnp.concatenate([params["wm"], params["wv"]], axis=1)
    bh = jnp.concatenate([params["bm"], params["bv"]], axis=1)
    return dict(
        w1=params["w1"].astype(jnp.bfloat16),
        b1=params["b1"].astype(jnp.float32),
        w2=params["w2"].astype(jnp.bfloat16),
        b2=params["b2"].astype(jnp.float32),
        wh=wh.astype(jnp.bfloat16),
        bh=bh.astype(jnp.float32),
        z_dim=int(params["wm"].shape[1]),
    )


def _choose_tiling(B, tb):
    """Pick (padded_batch, batch_tile).

    * Small batches (B <= min(tb, 256)): single tile, rows rounded up to 16
      (safe bf16 sublane granularity).
    * Larger batches: guarantee >= 2 grid programs so the 'parallel' batch axis
      shards across both v7x TensorCores; tile rows are a multiple of 128.
    """
    if B <= min(tb, 256):
        b_pad = _round_up(B, 16)
        return b_pad, b_pad
    tb_eff = min(tb, _round_up((B + 1) // 2, 128))
    tb_eff = max(tb_eff, 16)
    b_pad = _round_up(B, tb_eff)
    return b_pad, tb_eff


def encoder_forward(x, prep, *, tb=512):
    """x: (B, x_dim) float32. prep: output of prepare_params().
    Returns (mean, log_var), both (B, z_dim) float32."""
    B, x_dim = x.shape
    z_dim = prep["z_dim"]
    n_head = 2 * z_dim

    b_pad, tb_eff = _choose_tiling(B, tb)
    x_p = x.astype(jnp.float32)
    if b_pad != B:
        x_p = jnp.pad(x_p, ((0, b_pad - B), (0, 0)))

    const = lambda shape: pl.BlockSpec(shape, lambda i: (0, 0))     # VMEM-resident weights
    batched = lambda shape: pl.BlockSpec(shape, lambda i: (i, 0))   # batch-tiled

    cp_kwargs = dict(dimension_semantics=("parallel",))  # batch axis shards across TCs
    if tb_eff >= 1024:
        # v5e's default scoped VMEM is only 16 MiB; big tiles need headroom.
        cp_kwargs["vmem_limit_bytes"] = 32 << 20

    out = pl.pallas_call(
        encoder_kernel,
        out_shape=jax.ShapeDtypeStruct((b_pad, n_head), jnp.float32),
        grid_spec=pltpu.PrefetchScalarGridSpec(
            num_scalar_prefetch=0,
            grid=(b_pad // tb_eff,),
            in_specs=[
                batched((tb_eff, x_dim)),            # x tile (f32, cast in-kernel)
                const(prep["w1"].shape), const(prep["b1"].shape),
                const(prep["w2"].shape), const(prep["b2"].shape),
                const(prep["wh"].shape), const(prep["bh"].shape),
            ],
            out_specs=batched((tb_eff, n_head)),
        ),
        compiler_params=pltpu.CompilerParams(**cp_kwargs),
    )(x_p, prep["w1"], prep["b1"], prep["w2"], prep["b2"], prep["wh"], prep["bh"])

    mean = out[:B, :z_dim]
    log_var = out[:B, z_dim:n_head]
    return mean, log_var


def init_params(key, x_dim, z_dim):
    """Deterministic init mimicking nn.Linear (uniform +/- 1/sqrt(fan_in)).
    Weights are stored transposed vs. PyTorch: (in_features, out_features).
    Biases are stored as (1, fan_out) for direct broadcasting in the kernel."""
    def linear(key, fan_in, fan_out):
        kw, kb = jax.random.split(key)
        bound = 1.0 / jnp.sqrt(fan_in)
        w = jax.random.uniform(kw, (fan_in, fan_out), jnp.float32, -bound, bound)
        b = jax.random.uniform(kb, (1, fan_out), jnp.float32, -bound, bound)
        return w, b

    k1, k2, k3, k4 = jax.random.split(key, 4)
    w1, b1 = linear(k1, x_dim, 512)
    w2, b2 = linear(k2, 512, 256)
    wm, bm = linear(k3, 256, z_dim)
    wv, bv = linear(k4, 256, z_dim)
    return dict(w1=w1, b1=b1, w2=w2, b2=b2, wm=wm, bm=bm, wv=wv, bv=bv)


def encoder_ref(x, p):
    """Pure-JAX reference matching the PyTorch forward, with matmul operands
    rounded to bf16 (to match the kernel's MXU precision; f32 accumulation)."""
    c = lambda a: a.astype(jnp.bfloat16).astype(jnp.float32)
    h1 = jnp.maximum(c(x) @ c(p["w1"]) + p["b1"], 0.0)
    h2 = jnp.maximum(c(h1) @ c(p["w2"]) + p["b2"], 0.0)
    h2c = c(h2)
    return h2c @ c(p["wm"]) + p["bm"], h2c @ c(p["wv"]) + p["bv"]


if __name__ == "__main__":
    x_dim, z_dim = 32, 8
    key = jax.random.PRNGKey(0)
    kx, kp, kx2, kx3 = jax.random.split(key, 4)
    params = init_params(kp, x_dim, z_dim)
    prep = prepare_params(params)

    # Small single-tile case.
    B = 16
    x = jax.random.normal(kx, (B, x_dim), jnp.float32)
    mean, log_var = encoder_forward(x, prep)
    mean, log_var = jax.block_until_ready((mean, log_var))
    mean_ref, log_var_ref = encoder_ref(x, params)
    assert mean.shape == (B, z_dim) and log_var.shape == (B, z_dim)
    assert jnp.allclose(mean, mean_ref, atol=2e-2, rtol=2e-2)
    assert jnp.allclose(log_var, log_var_ref, atol=2e-2, rtol=2e-2)

    # Ragged multi-tile case (exercises batch padding + grid > 1 with small tiles).
    B2 = 40
    x2 = jax.random.normal(kx2, (B2, x_dim), jnp.float32)
    mean2, log_var2 = encoder_forward(x2, prep, tb=16)
    mean2, log_var2 = jax.block_until_ready((mean2, log_var2))
    mean2_ref, log_var2_ref = encoder_ref(x2, params)
    assert mean2.shape == (B2, z_dim) and log_var2.shape == (B2, z_dim)
    assert jnp.allclose(mean2, mean2_ref, atol=2e-2, rtol=2e-2)
    assert jnp.allclose(log_var2, log_var2_ref, atol=2e-2, rtol=2e-2)

    # Mid-size batch: exercises the ">= 2 parallel programs" split (v7x dual-TC path).
    B3 = 300
    x3 = jax.random.normal(kx3, (B3, x_dim), jnp.float32)
    mean3, log_var3 = encoder_forward(x3, prep)
    mean3, log_var3 = jax.block_until_ready((mean3, log_var3))
    mean3_ref, log_var3_ref = encoder_ref(x3, params)
    assert mean3.shape == (B3, z_dim) and log_var3.shape == (B3, z_dim)
    assert jnp.allclose(mean3, mean3_ref, atol=2e-2, rtol=2e-2)
    assert jnp.allclose(log_var3, log_var3_ref, atol=2e-2, rtol=2e-2)

    print("KERNEL_OK")
</pallas_src>

<mosaic_0001>
module attributes {stable_mosaic.version = 11 : i64} {
  func.func @encoder_kernel(%arg0: i32, %arg1: memref<16x32xf32, #tpu.memory_space<vmem>>, %arg2: memref<32x512xbf16, #tpu.memory_space<vmem>>, %arg3: memref<1x512xf32, #tpu.memory_space<vmem>>, %arg4: memref<512x256xbf16, #tpu.memory_space<vmem>>, %arg5: memref<1x256xf32, #tpu.memory_space<vmem>>, %arg6: memref<256x16xbf16, #tpu.memory_space<vmem>>, %arg7: memref<1x16xf32, #tpu.memory_space<vmem>>, %arg8: memref<16x16xf32, #tpu.memory_space<vmem>>) attributes {dimension_semantics = [#tpu.dimension_semantics<parallel>], iteration_bounds = array<i64: 1>, scalar_prefetch = 0 : i64, scratch_operands = 0 : i64, tpu.core_type = #tpu.core_type<tc>, window_params = [{transform_indices = @transform_0, window_bounds = array<i64: 16, 32>}, {pipeline_mode = #tpu.pipeline_mode<synchronous>, transform_indices = @transform_1, window_bounds = array<i64: 32, 512>}, {pipeline_mode = #tpu.pipeline_mode<synchronous>, transform_indices = @transform_2, window_bounds = array<i64: 1, 512>}, {pipeline_mode = #tpu.pipeline_mode<synchronous>, transform_indices = @transform_3, window_bounds = array<i64: 512, 256>}, {pipeline_mode = #tpu.pipeline_mode<synchronous>, transform_indices = @transform_4, window_bounds = array<i64: 1, 256>}, {pipeline_mode = #tpu.pipeline_mode<synchronous>, transform_indices = @transform_5, window_bounds = array<i64: 256, 16>}, {pipeline_mode = #tpu.pipeline_mode<synchronous>, transform_indices = @transform_6, window_bounds = array<i64: 1, 16>}, {transform_indices = @transform_7, window_bounds = array<i64: 16, 16>}]} {
    %c0 = arith.constant 0 : index
    %c0_0 = arith.constant 0 : index
    %0 = vector.load %arg1[%c0, %c0_0] : memref<16x32xf32, #tpu.memory_space<vmem>>, vector<16x32xf32>
    %1 = arith.truncf %0 : vector<16x32xf32> to vector<16x32xbf16>
    %c0_1 = arith.constant 0 : index
    %c0_2 = arith.constant 0 : index
    %2 = vector.load %arg2[%c0_1, %c0_2] : memref<32x512xbf16, #tpu.memory_space<vmem>>, vector<32x512xbf16>
    %cst = arith.constant dense<0.000000e+00> : vector<16x512xf32>
    %3 = tpu.matmul %1, %2, %cst {dimension_numbers = #tpu.dot_dimension_numbers<[1], [0], [0], [1], [0, 0, 1, 1], [], []>} : vector<16x32xbf16>, vector<32x512xbf16>, vector<16x512xf32> -> vector<16x512xf32>
    %c0_3 = arith.constant 0 : index
    %c0_4 = arith.constant 0 : index
    %4 = vector.load %arg3[%c0_3, %c0_4] : memref<1x512xf32, #tpu.memory_space<vmem>>, vector<1x512xf32>
    %5 = vector.broadcast %4 : vector<1x512xf32> to vector<16x512xf32>
    %6 = arith.addf %3, %5 : vector<16x512xf32>
    %cst_5 = arith.constant 0.000000e+00 : f32
    %7 = vector.broadcast %cst_5 : f32 to vector<16x512xf32>
    %8 = arith.maximumf %6, %7 : vector<16x512xf32>
    %9 = arith.truncf %8 : vector<16x512xf32> to vector<16x512xbf16>
    %c0_6 = arith.constant 0 : index
    %c0_7 = arith.constant 0 : index
    %10 = vector.load %arg4[%c0_6, %c0_7] : memref<512x256xbf16, #tpu.memory_space<vmem>>, vector<512x256xbf16>
    %cst_8 = arith.constant dense<0.000000e+00> : vector<16x256xf32>
    %11 = tpu.matmul %9, %10, %cst_8 {dimension_numbers = #tpu.dot_dimension_numbers<[1], [0], [0], [1], [0, 0, 1, 1], [], []>} : vector<16x512xbf16>, vector<512x256xbf16>, vector<16x256xf32> -> vector<16x256xf32>
    %c0_9 = arith.constant 0 : index
    %c0_10 = arith.constant 0 : index
    %12 = vector.load %arg5[%c0_9, %c0_10] : memref<1x256xf32, #tpu.memory_space<vmem>>, vector<1x256xf32>
    %13 = vector.broadcast %12 : vector<1x256xf32> to vector<16x256xf32>
    %14 = arith.addf %11, %13 : vector<16x256xf32>
    %cst_11 = arith.constant 0.000000e+00 : f32
    %15 = vector.broadcast %cst_11 : f32 to vector<16x256xf32>
    %16 = arith.maximumf %14, %15 : vector<16x256xf32>
    %17 = arith.truncf %16 : vector<16x256xf32> to vector<16x256xbf16>
    %c0_12 = arith.constant 0 : index
    %c0_13 = arith.constant 0 : index
    %18 = vector.load %arg6[%c0_12, %c0_13] : memref<256x16xbf16, #tpu.memory_space<vmem>>, vector<256x16xbf16>
    %cst_14 = arith.constant dense<0.000000e+00> : vector<16x16xf32>
    %19 = tpu.matmul %17, %18, %cst_14 {dimension_numbers = #tpu.dot_dimension_numbers<[1], [0], [0], [1], [0, 0, 1, 1], [], []>} : vector<16x256xbf16>, vector<256x16xbf16>, vector<16x16xf32> -> vector<16x16xf32>
    %c0_15 = arith.constant 0 : index
    %c0_16 = arith.constant 0 : index
    %20 = vector.load %arg7[%c0_15, %c0_16] : memref<1x16xf32, #tpu.memory_space<vmem>>, vector<1x16xf32>
    %21 = vector.broadcast %20 : vector<1x16xf32> to vector<16x16xf32>
    %22 = arith.addf %19, %21 : vector<16x16xf32>
    %c0_17 = arith.constant 0 : index
    %c0_18 = arith.constant 0 : index
    %23 = vector.load %arg8[%c0_17, %c0_18] : memref<16x16xf32, #tpu.memory_space<vmem>>, vector<16x16xf32>
    tpu.vector_store %arg8[%c0_17, %c0_18], %22 {strides = array<i32>} : memref<16x16xf32, #tpu.memory_space<vmem>>, vector<16x16xf32>,
    return
  }
  func.func @transform_0(%arg0: i32) -> (i32, i32) {
    %c0_i32 = arith.constant 0 : i32
    %c0_i32_0 = arith.constant 0 : i32
    return %arg0, %c0_i32 : i32, i32
  }
  func.func @transform_1(%arg0: i32) -> (i32, i32) {
    %c0_i32 = arith.constant 0 : i32
    %c0_i32_0 = arith.constant 0 : i32
    %c0_i32_1 = arith.constant 0 : i32
    return %c0_i32, %c0_i32_0 : i32, i32
  }
  func.func @transform_2(%arg0: i32) -> (i32, i32) {
    %c0_i32 = arith.constant 0 : i32
    %c0_i32_0 = arith.constant 0 : i32
    %c0_i32_1 = arith.constant 0 : i32
    return %c0_i32, %c0_i32_0 : i32, i32
  }
  func.func @transform_3(%arg0: i32) -> (i32, i32) {
    %c0_i32 = arith.constant 0 : i32
    %c0_i32_0 = arith.constant 0 : i32
    %c0_i32_1 = arith.constant 0 : i32
    return %c0_i32, %c0_i32_0 : i32, i32
  }
  func.func @transform_4(%arg0: i32) -> (i32, i32) {
    %c0_i32 = arith.constant 0 : i32
    %c0_i32_0 = arith.constant 0 : i32
    %c0_i32_1 = arith.constant 0 : i32
    return %c0_i32, %c0_i32_0 : i32, i32
  }
  func.func @transform_5(%arg0: i32) -> (i32, i32) {
    %c0_i32 = arith.constant 0 : i32
    %c0_i32_0 = arith.constant 0 : i32
    %c0_i32_1 = arith.constant 0 : i32
    return %c0_i32, %c0_i32_0 : i32, i32
  }
  func.func @transform_6(%arg0: i32) -> (i32, i32) {
    %c0_i32 = arith.constant 0 : i32
    %c0_i32_0 = arith.constant 0 : i32
    %c0_i32_1 = arith.constant 0 : i32
    return %c0_i32, %c0_i32_0 : i32, i32
  }
  func.func @transform_7(%arg0: i32) -> (i32, i32) {
    %c0_i32 = arith.constant 0 : i32
    %c0_i32_0 = arith.constant 0 : i32
    return %arg0, %c0_i32 : i32, i32
  }
}

</mosaic_0001>

<bundles_post_ra>
// kernel: tpu_custom_call.1
= control target key start
LH: loop header
LB: loop body
LE: loop exit
PB: predicated region body
PF: predicated region fallthrough
CT: control target
= control target key end

     0   :  { %12 = vsyncpa [#allocation3], 0  ;;  %s1545_s0 = inlined_call_operand.vmem [shape: f32[16,32], index: 0, kind: input, shape index: {}]   ;;  %s1546_s1 = inlined_call_operand.vmem [shape: bf16[32,512], index: 1, kind: input, shape index: {}]   ;;  %s1547_s2 = inlined_call_operand.vmem [shape: f32[1,512], index: 2, kind: input, shape index: {}]   ;;  %s1548_s3 = inlined_call_operand.hbm [shape: bf16[512,256], index: 3, kind: input, shape index: {}]   ;;  %s1549_s4 = inlined_call_operand.vmem [shape: f32[1,256], index: 4, kind: input, shape index: {}]   ;;  %s1550_s5 = inlined_call_operand.vmem [shape: bf16[256,16], index: 5, kind: input, shape index: {}]   ;;  %s1551_s6 = inlined_call_operand.vmem [shape: f32[1,16], index: 6, kind: input, shape index: {}]   ;;  %s1552_s7 = inlined_call_operand.hbm [shape: f32[16,16], index: 7, kind: output, shape index: {}]  }
   0x1   :  { %13 = vsyncpa [#allocation4], 0  ;;  %s24_s26 = sshll.u32 %s1548_s3, 4  ;;  %s1368_s27 = smov [#allocation2]   ;;  %s25_s26 = int_to_ptr.hbm [resolvable:$true] %s24_s26 }
   0x2   :  { %s26_s28 = sshll.u32 %s1368_s27, 4  ;;  %s1369_s29 = smov 128   ;;  %s27_s28 = int_to_ptr.vmem [resolvable:$true] %s26_s28 }
   0x3   :  { %s1370_s30 = smov 8  }
   0x4   :  { %32 = dma.hbm_to_vmem [thread:$0]  %s25_s26, 8192, %s27_s28, [#allocation3], %s1369_s29, %s1369_s29, %s1370_s30  }
   0x5   :  { %1364 = dma.done.wait [#allocation3], 8192  }
   0x6   :  { %1365 = vsyncadd [#allocation3], 4294959104  ;;  %v885_v0 = vld [vmem:[%s1546_s1 + $0x20] sm:$0xf]  ;;  %v1229_v1 = vld [vmem:[%s1546_s1 + $0x2c] sm:$0xf0] }
   0x7   :  { %v1227_v2 = vld [vmem:[%s1546_s1 + $0x24] sm:$0xf]  ;;  %v886_v3 = vor.u32 %v1229_v1, %v885_v0  ;;  %v887_v4 = vld [vmem:[%s1546_s1 + $0x30] sm:$0xf0]  ;;  %v869_v5 = vld [vmem:[%s1546_s1] sm:$0xf] }
   0x8   :  { %v1225_v6 = vld [vmem:[%s1546_s1 + $0xc] sm:$0xf0]  ;;  %v890_v7 = vor.u32 %v1227_v2, %v887_v4  ;;  %v1223_v8 = vld [vmem:[%s1546_s1 + $0x4] sm:$0xf]  ;;  %v871_v9 = vld [vmem:[%s1546_s1 + $0x10] sm:$0xf0] }
   0x9   :  { %v44_v10 = vld [vmem:[%s1545_s0] sm:$0xff]  ;;  %115 = vmatpush.bf16.msra.mxu2 %v886_v3  ;;  %v870_v11 = vor.u32 %v1225_v6, %v869_v5  ;;  %v45_v12 = vld [vmem:[%s1545_s0 + $0x8] sm:$0xff]  ;;  %vm105_vm0 = vcmask 261120   ;;  %v1230_v14 = vld [vmem:[%s1546_s1 + $0x34] sm:$0xf0]  ;;  %v874_v15 = vor.u32 %v1223_v8, %v871_v9  ;;  %vm845_vm1 = vcmask 130048  }
   0xa   :  { %v893_v13 = vld [vmem:[%s1546_s1 + $0x28] sm:$0xf]  ;;  %129 = vmatpush.bf16.msra.mxu3 %v890_v7  ;;  %v1228_v17 = vld [vmem:[%s1546_s1 + $0x2c] sm:$0xf]  ;;  %v895_v18 = vld [vmem:[%s1546_s1 + $0x38] sm:$0xf0]  ;;  %v1472_v24 = vpack.c.bf16 %v45_v12, %v44_v10 }
   0xb   :  { %v894_v16 = vor.u32 %v1230_v14, %v893_v13  ;;  %v877_v19 = vld [vmem:[%s1546_s1 + $0x8] sm:$0xf]  ;;  %v898_v20 = vor.u32 %v1228_v17, %v895_v18  ;;  %v1226_v21 = vld [vmem:[%s1546_s1 + $0x14] sm:$0xf0]  ;;  %v1224_v22 = vld [vmem:[%s1546_s1 + $0xc] sm:$0xf] }
   0xc   :  { %v879_v23 = vld [vmem:[%s1546_s1 + $0x18] sm:$0xf0]  ;;  %v961_v25 = vld [vmem:[#allocation2 + $0x70] sm:$0xf]  ;;  %v1246_v26 = vld [vmem:[#allocation2 + $0x74] sm:$0xf0]  ;;  %v878_v32 = vor.u32 %v1226_v21, %v877_v19 }
   0xd   :  { %v1025_v27 = vld [vmem:[#allocation2 + $0xf0] sm:$0xf]  ;;  %116 = vmatpush.bf16.msra.mxu2 %v870_v11  ;;  %v962_v28 = vor.u32 %v1246_v26, %v961_v25  ;;  %v1262_v29 = vld [vmem:[#allocation2 + $0xf4] sm:$0xf0]  ;;  %v953_v30 = vld [vmem:[#allocation2 + $0x60] sm:$0xf]  ;;  %v882_v36 = vor.u32 %v1224_v22, %v879_v23 }
   0xe   :  { %v1244_v31 = vld [vmem:[#allocation2 + $0x64] sm:$0xf0]  ;;  %130 = vmatpush.bf16.msra.mxu3 %v874_v15  ;;  %v1026_v33 = vor.u32 %v1262_v29, %v1025_v27  ;;  %v1017_v34 = vld [vmem:[#allocation2 + $0xe0] sm:$0xf]  ;;  %v945_v39 = vld [vmem:[#allocation2 + $0x50] sm:$0xf] }
   0xf   :  { %v1260_v35 = vld [vmem:[#allocation2 + $0xe4] sm:$0xf0]  ;;  %567 = vmatpush.bf16.msra.mxu0 %v962_v28  ;;  %v954_v37 = vor.u32 %v1244_v31, %v953_v30  ;;  %v1242_v40 = vld [vmem:[#allocation2 + $0x54] sm:$0xf0]  ;;  %v1009_v41 = vld [vmem:[#allocation2 + $0xd0] sm:$0xf] }
  0x10   :  { %899 = vmatmul.msk.bf16.vlgmr.msra.gmra.mxu2 %vm105_vm0, %v1472_v24  ;;  %581 = vmatpush.bf16.msra.mxu1 %v1026_v33  ;;  %v1018_v38 = vor.u32 %v1260_v35, %v1017_v34  ;;  %v1258_v42 = vld [vmem:[#allocation2 + $0xd4] sm:$0xf0]  ;;  %v1089_v43 = vld [vmem:[#allocation2 + $0x170] sm:$0xf]  ;;  %v946_v44 = vor.u32 %v1242_v40, %v945_v39  ;;  %v937_v49 = vld [vmem:[#allocation2 + $0x40] sm:$0xf] }
  0x11   :  { %143 = vmatpush.bf16.msrb.mxu2 %v894_v16  ;;  %900 = vmatmul.msk.bf16.vlgmr.msra.gmra.mxu3 %vm105_vm0, %v1472_v24  ;;  %v1278_v45 = vld [vmem:[#allocation2 + $0x174] sm:$0xf0]  ;;  %v1153_v46 = vld [vmem:[#allocation2 + $0x1f0] sm:$0xf]  ;;  %v1010_v48 = vor.u32 %v1258_v42, %v1009_v41  ;;  %v1240_v50 = vld [vmem:[#allocation2 + $0x44] sm:$0xf0] }
  0x12   :  { %157 = vmatpush.bf16.msrb.mxu3 %v898_v20  ;;  %v1294_v47 = vld [vmem:[#allocation2 + $0x1f4] sm:$0xf0]  ;;  %v1001_v51 = vld [vmem:[#allocation2 + $0xc0] sm:$0xf]  ;;  %v1090_v52 = vor.u32 %v1278_v45, %v1089_v43  ;;  %v1256_v54 = vld [vmem:[#allocation2 + $0xc4] sm:$0xf0]  ;;  %v938_v60 = vor.u32 %v1240_v50, %v937_v49 }
  0x13   :  { %568 = vmatpush.bf16.msra.mxu0 %v954_v37  ;;  %v1154_v53 = vor.u32 %v1294_v47, %v1153_v46  ;;  %v1081_v55 = vld [vmem:[#allocation2 + $0x160] sm:$0xf]  ;;  %v1276_v56 = vld [vmem:[#allocation2 + $0x164] sm:$0xf0]  ;;  %v929_v61 = vld [vmem:[#allocation2 + $0x30] sm:$0xf]  ;;  %v1002_v0 = vor.u32 %v1256_v54, %v1001_v51 }
  0x14   :  { %582 = vmatpush.bf16.msra.mxu1 %v1018_v38  ;;  %v1082_v57 = vor.u32 %v1276_v56, %v1081_v55  ;;  %v1145_v58 = vld [vmem:[#allocation2 + $0x1e0] sm:$0xf]  ;;  %v1292_v59 = vld [vmem:[#allocation2 + $0x1e4] sm:$0xf0]  ;;  %v1238_v62 = vld [vmem:[#allocation2 + $0x34] sm:$0xf0] }
  0x15   :  { %144 = vmatpush.bf16.msrb.mxu2 %v878_v32  ;;  %v1146_v63 = vor.u32 %v1292_v59, %v1145_v58  ;;  %v1073_v1 = vld [vmem:[#allocation2 + $0x150] sm:$0xf]  ;;  %v1274_v2 = vld [vmem:[#allocation2 + $0x154] sm:$0xf0]  ;;  %v1065_v9 = vld [vmem:[#allocation2 + $0x140] sm:$0xf]  ;;  %v930_v10 = vor.u32 %v1238_v62, %v929_v61 }
  0x16   :  { %158 = vmatpush.bf16.msrb.mxu3 %v882_v36  ;;  %v1137_v3 = vld [vmem:[#allocation2 + $0x1d0] sm:$0xf]  ;;  %v1254_v5 = vld [vmem:[#allocation2 + $0xb4] sm:$0xf0]  ;;  %v1074_v7 = vor.u32 %v1274_v2, %v1073_v1  ;;  %v1272_v11 = vld [vmem:[#allocation2 + $0x144] sm:$0xf0] }
  0x17   :  { %569 = vmatpush.bf16.msra.mxu0 %v946_v44  ;;  %v993_v4 = vld [vmem:[#allocation2 + $0xb0] sm:$0xf]  ;;  %v1290_v6 = vld [vmem:[#allocation2 + $0x1d4] sm:$0xf0]  ;;  %v1129_v12 = vld [vmem:[#allocation2 + $0x1c0] sm:$0xf]  ;;  %v1066_v19 = vor.u32 %v1272_v11, %v1065_v9 }
  0x18   :  { %583 = vmatpush.bf16.msra.mxu1 %v1010_v48  ;;  %v1138_v8 = vor.u32 %v1290_v6, %v1137_v3  ;;  %v1288_v13 = vld [vmem:[#allocation2 + $0x1c4] sm:$0xf0]  ;;  %v994_v14 = vor.u32 %v1254_v5, %v993_v4  ;;  %v921_v15 = vld [vmem:[#allocation2 + $0x20] sm:$0xf]  ;;  %v913_v23 = vld [vmem:[#allocation2 + $0x10] sm:$0xf] }
  0x19   :  { %595 = vmatpush.bf16.msra.mxu2 %v1090_v52  ;;  %v1236_v16 = vld [vmem:[#allocation2 + $0x24] sm:$0xf0]  ;;  %v985_v17 = vld [vmem:[#allocation2 + $0xa0] sm:$0xf]  ;;  %v1130_v20 = vor.u32 %v1288_v13, %v1129_v12  ;;  %v1234_v25 = vld [vmem:[#allocation2 + $0x14] sm:$0xf0] }
  0x1a   :  { %609 = vmatpush.bf16.msra.mxu3 %v1154_v53  ;;  %v1252_v18 = vld [vmem:[#allocation2 + $0xa4] sm:$0xf0]  ;;  %v922_v21 = vor.u32 %v1236_v16, %v921_v15  ;;  %v977_v26 = vld [vmem:[#allocation2 + $0x90] sm:$0xf]  ;;  %v1250_v27 = vld [vmem:[#allocation2 + $0x94] sm:$0xf0]  ;;  %v914_v28 = vor.u32 %v1234_v25, %v913_v23 }
  0x1b   :  { %570 = vmatpush.bf16.msra.mxu0 %v938_v60  ;;  %v986_v22 = vor.u32 %v1252_v18, %v985_v17  ;;  %v978_v29 = vor.u32 %v1250_v27, %v977_v26  ;;  %v905_v30 = vld [vmem:[#allocation2] sm:$0xf]  ;;  %v1232_v31 = vld [vmem:[#allocation2 + $0x4] sm:$0xf0]  ;;  %v1245_v36 = vld [vmem:[#allocation2 + $0x74] sm:$0xf] }
  0x1c   :  { %584 = vmatpush.bf16.msra.mxu1 %v1002_v0  ;;  %v969_v32 = vld [vmem:[#allocation2 + $0x80] sm:$0xf]  ;;  %v1248_v33 = vld [vmem:[#allocation2 + $0x84] sm:$0xf0]  ;;  %v906_v34 = vor.u32 %v1232_v31, %v905_v30  ;;  %v1261_v37 = vld [vmem:[#allocation2 + $0xf4] sm:$0xf] }
  0x1d   :  { %596 = vmatpush.bf16.msra.mxu2 %v1082_v57  ;;  %v970_v35 = vor.u32 %v1248_v33, %v969_v32  ;;  %v1027_v39 = vld [vmem:[#allocation2 + $0xf8] sm:$0xf0]  ;;  %v1057_v41 = vld [vmem:[#allocation2 + $0x130] sm:$0xf]  ;;  %v1270_v42 = vld [vmem:[#allocation2 + $0x134] sm:$0xf0] }
  0x1e   :  { %610 = vmatpush.bf16.msra.mxu3 %v1146_v63  ;;  %v1030_v40 = vor.u32 %v1261_v37, %v1027_v39  ;;  %v1121_v43 = vld [vmem:[#allocation2 + $0x1b0] sm:$0xf]  ;;  %v1058_v44 = vor.u32 %v1270_v42, %v1057_v41  ;;  %v1286_v45 = vld [vmem:[#allocation2 + $0x1b4] sm:$0xf0]  ;;  %v1243_v46 = vld [vmem:[#allocation2 + $0x64] sm:$0xf] }
  0x1f   :  { %571 = vmatpush.bf16.msra.mxu0 %v930_v10  ;;  %v1122_v47 = vor.u32 %v1286_v45, %v1121_v43  ;;  %v955_v48 = vld [vmem:[#allocation2 + $0x68] sm:$0xf0]  ;;  %v1259_v49 = vld [vmem:[#allocation2 + $0xe4] sm:$0xf]  ;;  %v1049_v53 = vld [vmem:[#allocation2 + $0x120] sm:$0xf] }
  0x20   :  { %901 = vmatmul.msk.bf16.vlgmr.msrb.gmra.mxu2 %vm105_vm0, %v1472_v24  ;;  %585 = vmatpush.bf16.msra.mxu1 %v994_v14  ;;  %v1019_v50 = vld [vmem:[#allocation2 + $0xe8] sm:$0xf0]  ;;  %v958_v51 = vor.u32 %v1243_v46, %v955_v48  ;;  %v1268_v54 = vld [vmem:[#allocation2 + $0x124] sm:$0xf0]  ;;  %v1113_v55 = vld [vmem:[#allocation2 + $0x1a0] sm:$0xf] }
  0x21   :  { %597 = vmatpush.bf16.msra.mxu2 %v1074_v7  ;;  %902 = vmatmul.msk.bf16.vlgmr.msrb.gmra.mxu3 %vm105_vm0, %v1472_v24  ;;  %v963_v24 = vld [vmem:[#allocation2 + $0x78] sm:$0xf0]  ;;  %v1022_v52 = vor.u32 %v1259_v49, %v1019_v50  ;;  %v1050_v56 = vor.u32 %v1268_v54, %v1049_v53  ;;  %v1284_v57 = vld [vmem:[#allocation2 + $0x1a4] sm:$0xf0]  ;;  %v1241_v59 = vld [vmem:[#allocation2 + $0x54] sm:$0xf] }
  0x22   :  { %611 = vmatpush.bf16.msra.mxu3 %v1138_v8  ;;  %v966_v38 = vor.u32 %v1245_v36, %v963_v24  ;;  %v1114_v58 = vor.u32 %v1284_v57, %v1113_v55  ;;  %v947_v60 = vld [vmem:[#allocation2 + $0x58] sm:$0xf0]  ;;  %v1257_v61 = vld [vmem:[#allocation2 + $0xd4] sm:$0xf]  ;;  %v1041_v1 = vld [vmem:[#allocation2 + $0x110] sm:$0xf] }
  0x23   :  { %572 = vmatpush.bf16.msra.mxu0 %v922_v21  ;;  %v950_v62 = vor.u32 %v1241_v59, %v947_v60  ;;  %v1011_v63 = vld [vmem:[#allocation2 + $0xd8] sm:$0xf0]  ;;  %v1266_v2 = vld [vmem:[#allocation2 + $0x114] sm:$0xf0]  ;;  %v1105_v3 = vld [vmem:[#allocation2 + $0x190] sm:$0xf] }
  0x24   :  { %586 = vmatpush.bf16.msra.mxu1 %v986_v22  ;;  %v1014_v0 = vor.u32 %v1257_v61, %v1011_v63  ;;  %v1042_v4 = vor.u32 %v1266_v2, %v1041_v1  ;;  %v1282_v5 = vld [vmem:[#allocation2 + $0x194] sm:$0xf0]  ;;  %v1239_v6 = vld [vmem:[#allocation2 + $0x44] sm:$0xf]  ;;  %v939_v7 = vld [vmem:[#allocation2 + $0x48] sm:$0xf0] }
  0x25   :  { %598 = vmatpush.bf16.msra.mxu2 %v1066_v19  ;;  %v1106_v8 = vor.u32 %v1282_v5, %v1105_v3  ;;  %v942_v9 = vor.u32 %v1239_v6, %v939_v7  ;;  %v1255_v10 = vld [vmem:[#allocation2 + $0xc4] sm:$0xf]  ;;  %v1003_v11 = vld [vmem:[#allocation2 + $0xc8] sm:$0xf0]  ;;  %v1033_v13 = vld [vmem:[#allocation2 + $0x100] sm:$0xf] }
  0x26   :  { %612 = vmatpush.bf16.msra.mxu3 %v1130_v20  ;;  %v1006_v12 = vor.u32 %v1255_v10, %v1003_v11  ;;  %v1264_v14 = vld [vmem:[#allocation2 + $0x104] sm:$0xf0]  ;;  %v1097_v15 = vld [vmem:[#allocation2 + $0x180] sm:$0xf]  ;;  %v1237_v18 = vld [vmem:[#allocation2 + $0x34] sm:$0xf] }
  0x27   :  { %573 = vmatpush.bf16.msra.mxu0 %v914_v28  ;;  %v1034_v16 = vor.u32 %v1264_v14, %v1033_v13  ;;  %v1280_v17 = vld [vmem:[#allocation2 + $0x184] sm:$0xf0]  ;;  %v931_v19 = vld [vmem:[#allocation2 + $0x38] sm:$0xf0]  ;;  %v1253_v22 = vld [vmem:[#allocation2 + $0xb4] sm:$0xf] }
  0x28   :  { %587 = vmatpush.bf16.msra.mxu1 %v978_v29  ;;  %v1098_v20 = vor.u32 %v1280_v17, %v1097_v15  ;;  %v934_v21 = vor.u32 %v1237_v18, %v931_v19  ;;  %v995_v23 = vld [vmem:[#allocation2 + $0xb8] sm:$0xf0]  ;;  %v1277_v25 = vld [vmem:[#allocation2 + $0x174] sm:$0xf]  ;;  %v1235_v32 = vld [vmem:[#allocation2 + $0x24] sm:$0xf] }
  0x29   :  { %599 = vmatpush.bf16.msra.mxu2 %v1058_v44  ;;  %v998_v26 = vor.u32 %v1253_v22, %v995_v23  ;;  %v1091_v27 = vld [vmem:[#allocation2 + $0x178] sm:$0xf0]  ;;  %v1293_v28 = vld [vmem:[#allocation2 + $0x1f4] sm:$0xf]  ;;  %v923_v33 = vld [vmem:[#allocation2 + $0x28] sm:$0xf0] }
  0x2a   :  { %613 = vmatpush.bf16.msra.mxu3 %v1122_v47  ;;  %v1094_v29 = vor.u32 %v1277_v25, %v1091_v27  ;;  %v1155_v30 = vld [vmem:[#allocation2 + $0x1f8] sm:$0xf0]  ;;  %v987_v36 = vld [vmem:[#allocation2 + $0xa8] sm:$0xf0]  ;;  %v1275_v24 = vld [vmem:[#allocation2 + $0x164] sm:$0xf] }
  0x2b   :  { %574 = vmatpush.bf16.msra.mxu0 %v906_v34  ;;  %v1158_v31 = vor.u32 %v1293_v28, %v1155_v30  ;;  %v926_v34 = vor.u32 %v1235_v32, %v923_v33  ;;  %v1291_v39 = vld [vmem:[#allocation2 + $0x1e4] sm:$0xf]  ;;  %v1233_v43 = vld [vmem:[#allocation2 + $0x14] sm:$0xf]  ;;  %v915_v44 = vld [vmem:[#allocation2 + $0x18] sm:$0xf0] }
  0x2c   :  { %588 = vmatpush.bf16.msra.mxu1 %v970_v35  ;;  %v1251_v35 = vld [vmem:[#allocation2 + $0xa4] sm:$0xf]  ;;  %v1249_v45 = vld [vmem:[#allocation2 + $0x94] sm:$0xf]  ;;  %v918_v46 = vor.u32 %v1233_v43, %v915_v44  ;;  %v979_v47 = vld [vmem:[#allocation2 + $0x98] sm:$0xf0] }
  0x2d   :  { %600 = vmatpush.bf16.msra.mxu2 %v1050_v56  ;;  %v990_v37 = vor.u32 %v1251_v35, %v987_v36  ;;  %v1273_v48 = vld [vmem:[#allocation2 + $0x154] sm:$0xf]  ;;  %v1075_v49 = vld [vmem:[#allocation2 + $0x158] sm:$0xf0]  ;;  %v982_v50 = vor.u32 %v1249_v45, %v979_v47  ;;  %v1231_v55 = vld [vmem:[#allocation2 + $0x4] sm:$0xf] }
  0x2e   :  { %614 = vmatpush.bf16.msra.mxu3 %v1114_v58  ;;  %v1139_v53 = vld [vmem:[#allocation2 + $0x1d8] sm:$0xf0]  ;;  %v907_v56 = vld [vmem:[#allocation2 + $0x8] sm:$0xf0]  ;;  %v1247_v57 = vld [vmem:[#allocation2 + $0x84] sm:$0xf] }
  0x2f   :  { %623 = vmatpush.bf16.msrb.mxu0 %v966_v38  ;;  %v1083_v38 = vld [vmem:[#allocation2 + $0x168] sm:$0xf0]  ;;  %v910_v58 = vor.u32 %v1231_v55, %v907_v56  ;;  %v1271_v60 = vld [vmem:[#allocation2 + $0x144] sm:$0xf]  ;;  %v1269_v3 = vld [vmem:[#allocation2 + $0x134] sm:$0xf] }
  0x30   :  { %637 = vmatpush.bf16.msrb.mxu1 %v1030_v40  ;;  %v1147_v40 = vld [vmem:[#allocation2 + $0x1e8] sm:$0xf0]  ;;  %v1086_v41 = vor.u32 %v1275_v24, %v1083_v38  ;;  %v1285_v5 = vld [vmem:[#allocation2 + $0x1b4] sm:$0xf]  ;;  %v1123_v7 = vld [vmem:[#allocation2 + $0x1b8] sm:$0xf0] }
  0x31   :  { %601 = vmatpush.bf16.msra.mxu2 %v1042_v4  ;;  %v1150_v42 = vor.u32 %v1291_v39, %v1147_v40  ;;  %v971_v59 = vld [vmem:[#allocation2 + $0x88] sm:$0xf0]  ;;  %v1059_v4 = vld [vmem:[#allocation2 + $0x138] sm:$0xf0]  ;;  %v1126_v10 = vor.u32 %v1285_v5, %v1123_v7  ;;  %v1267_v11 = vld [vmem:[#allocation2 + $0x124] sm:$0xf] }
  0x32   :  { %615 = vmatpush.bf16.msra.mxu3 %v1106_v8  ;;  %v1067_v61 = vld [vmem:[#allocation2 + $0x148] sm:$0xf0]  ;;  %v1062_v6 = vor.u32 %v1269_v3, %v1059_v4  ;;  %v55_v8 = vld [vmem:[%s1547_s2] sm:$0xf]  ;;  %v1283_v14 = vld [vmem:[#allocation2 + $0x1a4] sm:$0xf] }
  0x33   :  { %624 = vmatpush.bf16.msrb.mxu0 %v958_v51  ;;  %v1078_v51 = vor.u32 %v1273_v48, %v1075_v49  ;;  %v1070_v63 = vor.u32 %v1271_v60, %v1067_v61  ;;  %v1131_v1 = vld [vmem:[#allocation2 + $0x1c8] sm:$0xf0]  ;;  %v58_v18 = vperm.slane %v55_v8, 1  ;;  %v1281_v22 = vld [vmem:[#allocation2 + $0x194] sm:$0xf]  ;;  %v60_v47 = vperm.slane %v55_v8, 3 }
  0x34   :  { %638 = vmatpush.bf16.msrb.mxu1 %v1022_v52  ;;  %v1289_v52 = vld [vmem:[#allocation2 + $0x1d4] sm:$0xf]  ;;  %v1115_v15 = vld [vmem:[#allocation2 + $0x1a8] sm:$0xf0]  ;;  %v1107_v23 = vld [vmem:[#allocation2 + $0x198] sm:$0xf0] }
  0x35   :  { %602 = vmatpush.bf16.msra.mxu2 %v1034_v16  ;;  %v1142_v54 = vor.u32 %v1289_v52, %v1139_v53  ;;  %v57_v16 = vperm.slane %v55_v8, 0  ;;  %v1118_v19 = vor.u32 %v1283_v14, %v1115_v15  ;;  %v1263_v30 = vld [vmem:[#allocation2 + $0x104] sm:$0xf]  ;;  %v1099_v35 = vld [vmem:[#allocation2 + $0x188] sm:$0xf0]  ;;  %v1302_v60 = vld [vmem:[%s1550_s5 + $0x38] sm:$0xff] }
  0x36   :  { %616 = vmatpush.bf16.msra.mxu3 %v1098_v20  ;;  %v1265_v20 = vld [vmem:[#allocation2 + $0x114] sm:$0xf]  ;;  %v1296_v4 = vld [vmem:[%s1550_s5 + $0x8] sm:$0xff]  ;;  %v1307_v7 = vld [vmem:[%s1550_s5 + $0x60] sm:$0xff]  ;;  %s1371_s8 = smov [#allocation5]   ;;  %s854_s3 = sshll.u32 %s1552_s7, 4  ;;  %s855_s3 = int_to_ptr.hbm [resolvable:$true] %s854_s3 }
  0x37   :  { %625 = vmatpush.bf16.msrb.mxu0 %v950_v62  ;;  %v974_v62 = vor.u32 %v1247_v57, %v971_v59  ;;  %v1301_v61 = vld [vmem:[%s1550_s5 + $0x30] sm:$0xff]  ;;  %v1308_v5 = vld [vmem:[%s1550_s5 + $0x68] sm:$0xff]  ;;  %s852_s9 = sshll.u32 %s1371_s8, 4  ;;  %s853_s9 = int_to_ptr.vmem [resolvable:$true] %s852_s9 }
  0x38   :  { %639 = vmatpush.bf16.msrb.mxu1 %v1014_v0  ;;  %v1287_v0 = vld [vmem:[#allocation2 + $0x1c4] sm:$0xf]  ;;  %v1309_v3 = vld [vmem:[%s1550_s5 + $0x70] sm:$0xff] }
  0x39   :  { %651 = vmatpush.bf16.msrb.mxu2 %v1094_v29  ;;  %v1134_v2 = vor.u32 %v1287_v0, %v1131_v1  ;;  %v1110_v29 = vor.u32 %v1281_v22, %v1107_v23  ;;  %v1298_v0 = vld [vmem:[%s1550_s5 + $0x18] sm:$0xff] }
  0x3a   :  { %665 = vmatpush.bf16.msrb.mxu3 %v1158_v31  ;;  %v1035_v31 = vld [vmem:[#allocation2 + $0x108] sm:$0xf0]  ;;  %v1310_v1 = vld [vmem:[%s1550_s5 + $0x78] sm:$0xff] }
  0x3b   :  { %626 = vmatpush.bf16.msrb.mxu0 %v942_v9  ;;  %v1038_v38 = vor.u32 %v1263_v30, %v1035_v31 }
  0x3c   :  { %640 = vmatpush.bf16.msrb.mxu1 %v1006_v12  ;;  %v1051_v12 = vld [vmem:[#allocation2 + $0x128] sm:$0xf0] }
  0x3d   :  { %652 = vmatpush.bf16.msrb.mxu2 %v1086_v41  ;;  %v1054_v17 = vor.u32 %v1267_v11, %v1051_v12  ;;  %v241_v11 = vld [vmem:[%s1549_s4] sm:$0x3] }
  0x3e   :  { %666 = vmatpush.bf16.msrb.mxu3 %v1150_v42  ;;  %v243_v14 = vperm.slane %v241_v11, 0  ;;  %v244_v31 = vperm.slane %v241_v11, 1 }
  0x3f   :  { %627 = vmatpush.bf16.msrb.mxu0 %v934_v21  ;;  %v1043_v21 = vld [vmem:[#allocation2 + $0x118] sm:$0xf0] }
  0x40   :  { %641 = vmatpush.bf16.msrb.mxu1 %v998_v26  ;;  %v1046_v26 = vor.u32 %v1265_v20, %v1043_v21 }
  0x41   :  { %653 = vmatpush.bf16.msrb.mxu2 %v1078_v51 }
  0x42   :  { %667 = vmatpush.bf16.msrb.mxu3 %v1142_v54 }
  0x43   :  { %628 = vmatpush.bf16.msrb.mxu0 %v926_v34  ;;  %v1279_v34 = vld [vmem:[#allocation2 + $0x184] sm:$0xf] }
  0x44   :  { %642 = vmatpush.bf16.msrb.mxu1 %v990_v37  ;;  %v1102_v41 = vor.u32 %v1279_v34, %v1099_v35 }
  0x45   :  { %654 = vmatpush.bf16.msrb.mxu2 %v1070_v63  ;;  %v1299_v63 = vld [vmem:[%s1550_s5 + $0x20] sm:$0xff] }
  0x46   :  { %668 = vmatpush.bf16.msrb.mxu3 %v1134_v2  ;;  %v1297_v2 = vld [vmem:[%s1550_s5 + $0x10] sm:$0xff] }
  0x47   :  { %629 = vmatpush.bf16.msrb.mxu0 %v918_v46  ;;  %v59_v46 = vperm.slane %v55_v8, 2  ;;  %v1306_v8 = vld [vmem:[%s1550_s5 + $0x58] sm:$0xff] }
  0x48   :  { %643 = vmatpush.bf16.msrb.mxu1 %v982_v50 }
  0x49   :  { %655 = vmatpush.bf16.msrb.mxu2 %v1062_v6  ;;  %v1295_v6 = vld [vmem:[%s1550_s5] sm:$0xff] }
  0x4a   :  { %669 = vmatpush.bf16.msrb.mxu3 %v1126_v10  ;;  %v1305_v10 = vld [vmem:[%s1550_s5 + $0x50] sm:$0xff] }
  0x4b   :  { %630 = vmatpush.bf16.msrb.mxu0 %v910_v58 }
  0x4c   :  { %644 = vmatpush.bf16.msrb.mxu1 %v974_v62  ;;  %v1300_v62 = vld [vmem:[%s1550_s5 + $0x28] sm:$0xff] }
  0x4d   :  { %656 = vmatpush.bf16.msrb.mxu2 %v1054_v17 }
  0x4e   :  { %670 = vmatpush.bf16.msrb.mxu3 %v1118_v19 }
  0x51   :  { %657 = vmatpush.bf16.msrb.mxu2 %v1046_v26 }
  0x52   :  { %671 = vmatpush.bf16.msrb.mxu3 %v1110_v29 }
  0x55   :  { %658 = vmatpush.bf16.msrb.mxu2 %v1038_v38 }
  0x56   :  { %672 = vmatpush.bf16.msrb.mxu3 %v1102_v41 }
  0x93   :  { %v118_v9 = vpop.f32.mrf.mxu2 }
  0x94   :  { %v132_v13 = vpop.f32.mrf.mxu3  ;;  %v119_v25 = vadd.f32 %v118_v9, %v57_v16 }
  0x95   :  { %v133_v27 = vadd.f32 %v132_v13, %v58_v18  ;;  %v1304_v13 = vld [vmem:[%s1550_s5 + $0x48] sm:$0xff] }
  0x96   :  { %v165_v24 = vmax.f32 %v119_v25, 0.0 }
  0x97   :  { %v166_v39 = vmax.f32 %v133_v27, 0.0 }
  0x9b   :  { %v120_v28 = vpop.f32.mrf.mxu2 }
  0x9c   :  { %v121_v32 = vadd.f32 %v120_v28, %v57_v16  ;;  %v134_v33 = vpop.f32.mrf.mxu3  ;;  %v1303_v16 = vld [vmem:[%s1550_s5 + $0x40] sm:$0xff] }
  0x9d   :  { %v135_v36 = vadd.f32 %v134_v33, %v58_v18 }
  0x9e   :  { %v169_v37 = vmax.f32 %v121_v32, 0.0 }
  0x9f   :  { %v170_v40 = vmax.f32 %v135_v36, 0.0 }
  0xa0   :  { %v173_v42 = vpack.c.bf16 %v169_v37, %v165_v24 }
  0xa1   :  { %v174_v43 = vpack.c.bf16 %v170_v40, %v166_v39 }
  0xa2   :  { %575 = vmatmul.bf16.vlgmr.msra.gmra.mxu0 %v173_v42 }
  0xa3   :  { %589 = vmatmul.bf16.vlgmr.msra.gmra.mxu1 %v174_v43  ;;  %v146_v44 = vpop.f32.mrf.mxu2  ;;  %817 = vmatpush.bf16.msra.mxu0 %v1302_v60 }
  0xa4   :  { %v160_v45 = vpop.f32.mrf.mxu3  ;;  %v147_v48 = vadd.f32 %v146_v44, %v59_v46  ;;  %831 = vmatpush.bf16.msra.mxu1 %v1310_v1 }
  0xa5   :  { %v161_v49 = vadd.f32 %v160_v45, %v60_v47 }
  0xa6   :  { %v167_v54 = vmax.f32 %v147_v48, 0.0 }
  0xa7   :  { %v168_v56 = vmax.f32 %v161_v49, 0.0  ;;  %818 = vmatpush.bf16.msra.mxu0 %v1301_v61 }
  0xa8   :  { %832 = vmatpush.bf16.msra.mxu1 %v1309_v3 }
  0xab   :  { %v148_v50 = vpop.f32.mrf.mxu2  ;;  %819 = vmatpush.bf16.msra.mxu0 %v1300_v62 }
  0xac   :  { %v149_v51 = vadd.f32 %v148_v50, %v59_v46  ;;  %v162_v52 = vpop.f32.mrf.mxu3  ;;  %833 = vmatpush.bf16.msra.mxu1 %v1308_v5 }
  0xad   :  { %v163_v53 = vadd.f32 %v162_v52, %v60_v47 }
  0xae   :  { %v171_v55 = vmax.f32 %v149_v51, 0.0 }
  0xaf   :  { %v172_v57 = vmax.f32 %v163_v53, 0.0  ;;  %820 = vmatpush.bf16.msra.mxu0 %v1299_v63 }
  0xb0   :  { %v175_v58 = vpack.c.bf16 %v171_v55, %v167_v54  ;;  %834 = vmatpush.bf16.msra.mxu1 %v1307_v7  ;;  %v1315_v54 = vld [vmem:[%s1551_s6] ss:$0 sm:$0xff] }
  0xb1   :  { %v176_v59 = vpack.c.bf16 %v172_v57, %v168_v56 }
  0xb2   :  { %603 = vmatmul.bf16.vlgmr.msra.gmra.mxu2 %v175_v58  ;;  %631 = vmatmul.bf16.vlgmr.msrb.gmra.mxu0 %v173_v42 }
  0xb3   :  { %617 = vmatmul.bf16.vlgmr.msra.gmra.mxu3 %v176_v59  ;;  %645 = vmatmul.bf16.vlgmr.msrb.gmra.mxu1 %v174_v43 }
  0xb4   :  { %821 = vmatpush.bf16.msra.mxu0 %v1298_v0  ;;  %835 = vmatpush.bf16.msra.mxu1 %v1306_v8 }
  0xb8   :  { %822 = vmatpush.bf16.msra.mxu0 %v1297_v2  ;;  %836 = vmatpush.bf16.msra.mxu1 %v1305_v10 }
  0xbc   :  { %823 = vmatpush.bf16.msra.mxu0 %v1296_v4  ;;  %837 = vmatpush.bf16.msra.mxu1 %v1304_v13 }
  0xc0   :  { %824 = vmatpush.bf16.msra.mxu0 %v1295_v6  ;;  %838 = vmatpush.bf16.msra.mxu1 %v1303_v16 }
  0xc2   :  { %659 = vmatmul.bf16.vlgmr.msrb.gmra.mxu2 %v175_v58 }
  0xc3   :  { %673 = vmatmul.bf16.vlgmr.msrb.gmra.mxu3 %v176_v59 }
 0x11f   :  { %v576_v9 = vpop.f32.mrf.mxu0 }
 0x120   :  { %v590_v12 = vpop.f32.mrf.mxu1  ;;  %v577_v17 = vadd.f32 %v576_v9, %v243_v14 }
 0x122   :  { %v591_v21 = vadd.f32 %v590_v12, %v577_v17 }
 0x127   :  { %v578_v15 = vpop.f32.mrf.mxu0 }
 0x128   :  { %v592_v20 = vpop.f32.mrf.mxu1  ;;  %v579_v22 = vadd.f32 %v578_v15, %v243_v14 }
 0x12a   :  { %v593_v26 = vadd.f32 %v592_v20, %v579_v22 }
 0x12f   :  { %v632_v25 = vpop.f32.mrf.mxu0 }
 0x130   :  { %v646_v33 = vpop.f32.mrf.mxu1  ;;  %v633_v36 = vadd.f32 %v632_v25, %v244_v31 }
 0x132   :  { %v647_v40 = vadd.f32 %v646_v33, %v633_v36 }
 0x135   :  { %v604_v18 = vpop.f32.mrf.mxu2 }
 0x136   :  { %v618_v19 = vpop.f32.mrf.mxu3  ;;  %v605_v23 = vadd.f32 %v604_v18, %v591_v21 }
 0x137   :  { %v634_v37 = vpop.f32.mrf.mxu0 }
 0x138   :  { %v619_v28 = vadd.f32 %v618_v19, %v605_v23  ;;  %v635_v41 = vadd.f32 %v634_v37, %v244_v31  ;;  %v648_v43 = vpop.f32.mrf.mxu1 }
 0x13a   :  { %v679_v34 = vmax.f32 %v619_v28, 0.0  ;;  %v649_v44 = vadd.f32 %v648_v43, %v635_v41 }
 0x13d   :  { %v606_v27 = vpop.f32.mrf.mxu2 }
 0x13e   :  { %v607_v29 = vadd.f32 %v606_v27, %v593_v26  ;;  %v620_v30 = vpop.f32.mrf.mxu3 }
 0x140   :  { %v621_v32 = vadd.f32 %v620_v30, %v607_v29 }
 0x142   :  { %v681_v35 = vmax.f32 %v621_v32, 0.0 }
 0x144   :  { %v683_v24 = vpack.c.bf16 %v681_v35, %v679_v34 }
 0x145   :  { %v660_v38 = vpop.f32.mrf.mxu2 }
 0x146   :  { %v674_v39 = vpop.f32.mrf.mxu3  ;;  %825 = vmatmul.bf16.vlgmr.msra.gmra.mxu0 %v683_v24  ;;  %v661_v42 = vadd.f32 %v660_v38, %v647_v40 }
 0x148   :  { %v675_v46 = vadd.f32 %v674_v39, %v661_v42 }
 0x14a   :  { %v680_v50 = vmax.f32 %v675_v46, 0.0 }
 0x14d   :  { %v662_v45 = vpop.f32.mrf.mxu2 }
 0x14e   :  { %v663_v47 = vadd.f32 %v662_v45, %v649_v44  ;;  %v676_v48 = vpop.f32.mrf.mxu3 }
 0x150   :  { %v677_v49 = vadd.f32 %v676_v48, %v663_v47 }
 0x152   :  { %v682_v51 = vmax.f32 %v677_v49, 0.0 }
 0x154   :  { %v684_v52 = vpack.c.bf16 %v682_v51, %v680_v50 }
 0x156   :  { %839 = vmatmul.bf16.vlgmr.msra.gmra.mxu1 %v684_v52 }
 0x1c3   :  { %v826_v53 = vpop.f32.mrf.mxu0 }
 0x1c4   :  { %v827_v55 = vadd.f32 %v1315_v54, %v826_v53 }
 0x1cb   :  { %v828_v58 = vpop.f32.mrf.mxu0 }
 0x1cc   :  { %v829_v59 = vadd.f32 %v1315_v54, %v828_v58 }
 0x1d3   :  { %v840_v56 = vpop.f32.mrf.mxu1 }
 0x1d4   :  { %v841_v57 = vadd.f32 %v840_v56, %v827_v55 }
 0x1d6   :  { %846 = vst.msk [vmem:[#allocation5] sm:$0xff] %vm845_vm1, %v841_v57 }
 0x1db   :  { %v842_v60 = vpop.f32.mrf.mxu1 }
 0x1dc   :  { %v843_v61 = vadd.f32 %v842_v60, %v829_v59 }
 0x1de   :  { %847 = vst.msk [vmem:[#allocation5 + $0x8] sm:$0xff] %vm845_vm1, %v843_v61 }
 0x1df   :  { %860 = dma.vmem_to_hbm [thread:$0]  %s853_s9, 256, %s855_s3, [#allocation4], %s1369_s29, %s1369_s29, %s1370_s30  }
 0x1e0   :  { %1366 = dma.done.wait [#allocation4], 256  }
 0x1e1   :  { %1367 = vsyncadd [#allocation4], 4294967040 }
 0x1e2   :  { %865 = vsyncpa [#allocation3], 1 }
 0x1e3   :  { %866 = vsyncpa [#allocation4], 1 }

</bundles_post_ra>
